<compile_context>
chip_gen: v7x
topology: tpu7x:2x2x1
jax: 0.10.0
libtpu: 0.0.40
codegen_flags: <defaults>
</compile_context>

<pallas_src>
import jax
import jax.numpy as jnp
from jax.experimental import pallas as pl
from jax.experimental.pallas import tpu as pltpu


def _dma_identity_kernel(x_hbm, o_hbm):
    # One direct HBM->HBM DMA: no VMEM staging, no vector load/store slots.
    def body(sem):
        cp = pltpu.make_async_copy(x_hbm, o_hbm, sem)
        cp.start()
        cp.wait()

    pl.run_scoped(body, pltpu.SemaphoreType.DMA(()))


def qnn_forward(x: jax.Array) -> jax.Array:
    """QNN.forward(x) == x.  Fast path: no data movement at all."""
    return x


def qnn_forward_pallas(x: jax.Array) -> jax.Array:
    """Pallas-kernel version of the same identity semantics.

    Copies x into a fresh output buffer via a single HBM->HBM DMA issued by
    the DMA engine (no VMEM round-trip, no tiling, works for any shape/dtype).

    NOTE: if buffer donation is acceptable, input_output_aliases={0: 0} with a
    no-op body would make even this copy free, but the caller could then no
    longer reuse `x`, so the non-donating copy is kept here.
    """
    if x.size == 0:
        # Nothing to copy; identity of an empty array.
        return x

    nbytes = x.size * jnp.dtype(x.dtype).itemsize
    return pl.pallas_call(
        _dma_identity_kernel,
        out_shape=jax.ShapeDtypeStruct(x.shape, x.dtype),
        in_specs=[pl.BlockSpec(memory_space=pl.ANY)],
        out_specs=pl.BlockSpec(memory_space=pl.ANY),
        cost_estimate=pl.CostEstimate(
            flops=0,
            transcendentals=0,
            bytes_accessed=2 * nbytes,
        ),
    )(x)


# TODO(synk): QNN/QuantumModel define no parameters or quantum-circuit logic
# in the reference code, so there are no weights to initialize here.


if __name__ == "__main__":
    key = jax.random.PRNGKey(0)
    # Small NCHW-style input consistent with a typical conv/quantum-hybrid model.
    x = jax.random.normal(key, (2, 4, 16, 16), dtype=jnp.float32)

    # Fast path (what production code should use): zero-cost identity.
    y_fast = qnn_forward(x)

    # Pallas kernel path (runs the kernel once): direct HBM->HBM DMA copy.
    y = qnn_forward_pallas(x)
    y = jax.block_until_ready(y)

    # Forward pass is identity — verify exact equality.
    assert y.shape == x.shape
    assert y.dtype == x.dtype
    assert bool(jnp.all(y == x))
    assert bool(jnp.all(y_fast == x))

    print("KERNEL_OK")
</pallas_src>

<mosaic_0001>
module attributes {stable_mosaic.version = 11 : i64} {
  func.func @_dma_identity_kernel(%arg0: memref<2x4x16x16xf32, #tpu.memory_space<any>>, %arg1: memref<2x4x16x16xf32, #tpu.memory_space<any>>) attributes {dimension_semantics = [], scalar_prefetch = 0 : i64, scratch_operands = 0 : i64, tpu.core_type = #tpu.core_type<tc>} {
    "tpu.region"() ({
      %0 = tpu.sem_alloc : memref<!tpu.dma_semaphore, #tpu.memory_space<semaphore_mem>>
      tpu.enqueue_dma source(%arg0 : memref<2x4x16x16xf32, #tpu.memory_space<any>>) target(%arg1 : memref<2x4x16x16xf32, #tpu.memory_space<any>>) target_semaphore(%0 : memref<!tpu.dma_semaphore, #tpu.memory_space<semaphore_mem>>)
      tpu.wait_dma2 semaphore(%0 : memref<!tpu.dma_semaphore, #tpu.memory_space<semaphore_mem>>) src(%arg0 : memref<2x4x16x16xf32, #tpu.memory_space<any>>) dst(%arg1 : memref<2x4x16x16xf32, #tpu.memory_space<any>>)
      tpu.yield
    }) : () -> ()
    return
  }
}

</mosaic_0001>

<bundles_post_ra>
// kernel: tpu_custom_call.1
= control target key start
LH: loop header
LB: loop body
LE: loop exit
PB: predicated region body
PF: predicated region fallthrough
CT: control target
= control target key end

     0   :  { %s29_s6 = smov [#allocation2]   ;;  %s30_s7 = smov [#allocation3]   ;;  %s48_s0 = inlined_call_operand.hbm [shape: f32[2,4,16,16], index: 0, kind: input, shape index: {}]   ;;  %s49_s1 = inlined_call_operand.hbm [shape: f32[2,4,16,16], index: 1, kind: output, shape index: {}]  }
   0x1   :  { %s31_s8 = smov 0  }
   0x2   :  { %18 = dma.general %s48_s0, 2048, %s49_s1, %s29_s6, %s30_s7, [#allocation4], %s31_s8, 0  }
   0x3   :  { %27 = dma.done.wait [#allocation2], 2048 }
   0x4   :  { %28 = vsyncadd [#allocation2], 4294965248 }

</bundles_post_ra>
